<compile_context>
chip_gen: v5e
topology: v5e:2x2
jax: 0.10.0
libtpu: 0.0.40
codegen_flags: <defaults>
</compile_context>

<pallas_src>
import functools

import jax
import jax.numpy as jnp
from jax.experimental import pallas as pl
from jax.experimental.pallas import tpu as pltpu


def _choose_l_tile(L, C, itemsize, target_bytes=2 << 20):
    """Largest multiple-of-8 divisor of L whose (TL, C) tile is <= ~target_bytes."""
    target = max(8, min(L, target_bytes // max(1, C * itemsize)))
    if L <= target:
        return L
    for t in range(int(target), 7, -1):
        if L % t == 0 and t % 8 == 0:
            return t
    return L  # fallback: single full-extent block along L (always legal)


def _sigmoid(z):
    return 1.0 / (1.0 + jnp.exp(-z))


# ---------------------------------------------------------------------------
# Fused single-pass kernel: one grid step per batch element.
# ---------------------------------------------------------------------------
def _fused_kernel(inv_l, x_ref, w1t_ref, w2t_ref, o_ref):
    # x_ref  : (1, L, C)   whole slab for one batch element (channels on lanes)
    # w1t_ref: (C, Cmid)   fc1[0].weight.T  (shared by avg and max branches)
    # w2t_ref: (Cmid, C)   fc1[2].weight.T
    # o_ref  : (1, L, C)
    x = x_ref[0].astype(jnp.float32)                               # (L, C)
    avg = jnp.sum(x, axis=0, keepdims=True) * inv_l                # (1, C)
    mx = jnp.max(x, axis=0, keepdims=True)                         # (1, C)

    def fc(v):  # Conv1x1 -> ReLU -> Conv1x1 on a (1, C) row vector
        h = jnp.maximum(
            jnp.dot(v, w1t_ref[...], preferred_element_type=jnp.float32), 0.0)
        return jnp.dot(h, w2t_ref[...], preferred_element_type=jnp.float32)

    att = _sigmoid(fc(avg) + fc(mx))                               # (1, C)
    o_ref[0] = (x * att).astype(o_ref.dtype)


# ---------------------------------------------------------------------------
# Two-pass fallback kernels (large L*C that does not fit in VMEM per batch).
# ---------------------------------------------------------------------------
def _attention_kernel(inv_l, x_ref, w1t_ref, w2t_ref, att_ref, sum_sc, max_sc):
    # grid=(B, L/TL); the L axis is an "arbitrary" reduction axis.
    li = pl.program_id(1)

    @pl.when(li == 0)
    def _init():
        sum_sc[...] = jnp.zeros_like(sum_sc)
        max_sc[...] = jnp.full_like(max_sc, -jnp.inf)

    x = x_ref[0].astype(jnp.float32)                               # (TL, C)
    sum_sc[...] += jnp.sum(x, axis=0, keepdims=True)               # (1, C)
    max_sc[...] = jnp.maximum(max_sc[...], jnp.max(x, axis=0, keepdims=True))

    @pl.when(li == pl.num_programs(1) - 1)
    def _finalize():
        avg = sum_sc[...] * inv_l                                  # (1, C)

        def fc(v):
            h = jnp.maximum(
                jnp.dot(v, w1t_ref[...], preferred_element_type=jnp.float32), 0.0)
            return jnp.dot(h, w2t_ref[...], preferred_element_type=jnp.float32)

        z = fc(avg) + fc(max_sc[...])                              # (1, C)
        att_ref[0] = _sigmoid(z).astype(att_ref.dtype)


def _scale_kernel(x_ref, att_ref, o_ref):
    # x_ref: (1, TL, C), att_ref: (1, 1, C) -> broadcast multiply over the L tile
    o_ref[...] = (x_ref[...].astype(jnp.float32) * att_ref[...]).astype(o_ref.dtype)


# ---------------------------------------------------------------------------
# Wrapper
# ---------------------------------------------------------------------------
def channel_attention(x, w1, w2, *, force_two_pass=False):
    """ChannelAttention forward.

    x : (B, L, C) float, L = h*h
    w1: (C//rate, C)  == Conv2d(C, C//rate, 1, bias=False).weight[:, :, 0, 0]
    w2: (C, C//rate)  == Conv2d(C//rate, C, 1, bias=False).weight[:, :, 0, 0]
    returns (B, L, C)
    """
    B, L, C = x.shape
    Cmid = w1.shape[0]
    inv_l = 1.0 / float(L)

    w1t = jnp.asarray(w1, jnp.float32).T                           # (C, Cmid)
    w2t = jnp.asarray(w2, jnp.float32).T                           # (Cmid, C)

    itemsize = jnp.dtype(x.dtype).itemsize
    slab_bytes = L * C * max(itemsize, 4)                          # f32 working copy
    # Double-buffered input + output + working registers must fit well inside
    # the default scoped VMEM budget; keep generous headroom (8 MiB threshold).
    use_fused = (not force_two_pass) and (5 * slab_bytes <= (8 << 20))

    if use_fused:
        # One HBM read + one HBM write of x.
        return pl.pallas_call(
            functools.partial(_fused_kernel, inv_l),
            out_shape=jax.ShapeDtypeStruct((B, L, C), x.dtype),
            grid=(B,),
            in_specs=[
                pl.BlockSpec((1, L, C), lambda b: (b, 0, 0)),
                pl.BlockSpec((C, Cmid), lambda b: (0, 0)),
                pl.BlockSpec((Cmid, C), lambda b: (0, 0)),
            ],
            out_specs=pl.BlockSpec((1, L, C), lambda b: (b, 0, 0)),
            compiler_params=pltpu.CompilerParams(
                dimension_semantics=("parallel",)),
        )(x, w1t, w2t)

    # ---- two-pass fallback -------------------------------------------------
    TL = _choose_l_tile(L, C, itemsize)
    n_l = L // TL

    # Pass 1: per-channel mean/max over L + shared MLP + sigmoid -> (B, 1, C).
    att = pl.pallas_call(
        functools.partial(_attention_kernel, inv_l),
        out_shape=jax.ShapeDtypeStruct((B, 1, C), jnp.float32),
        grid=(B, n_l),
        in_specs=[
            pl.BlockSpec((1, TL, C), lambda b, l: (b, l, 0)),
            pl.BlockSpec((C, Cmid), lambda b, l: (0, 0)),
            pl.BlockSpec((Cmid, C), lambda b, l: (0, 0)),
        ],
        out_specs=pl.BlockSpec((1, 1, C), lambda b, l: (b, 0, 0)),
        scratch_shapes=[pltpu.VMEM((1, C), jnp.float32),   # running sum
                        pltpu.VMEM((1, C), jnp.float32)],  # running max
        compiler_params=pltpu.CompilerParams(
            dimension_semantics=("parallel", "arbitrary")),
    )(x, w1t, w2t)

    # Pass 2: out = x * att, tiled over L, fully parallel (megacore-shardable).
    # TODO(synk): for C < 128 the store is lane-masked; real deployments with
    # C a multiple of 128 are lane-dense automatically.
    out = pl.pallas_call(
        _scale_kernel,
        out_shape=jax.ShapeDtypeStruct((B, L, C), x.dtype),
        grid=(B, n_l),
        in_specs=[
            pl.BlockSpec((1, TL, C), lambda b, l: (b, l, 0)),
            pl.BlockSpec((1, 1, C), lambda b, l: (b, 0, 0)),
        ],
        out_specs=pl.BlockSpec((1, TL, C), lambda b, l: (b, l, 0)),
        compiler_params=pltpu.CompilerParams(
            dimension_semantics=("parallel", "parallel")),
    )(x, att)
    return out


def channel_attention_ref(x, w1, w2):
    """Pure-JAX reference matching the PyTorch module."""
    avg = jnp.mean(x, axis=1)                                      # (B, C)
    mx = jnp.max(x, axis=1)                                        # (B, C)

    def fc(v):
        return jnp.maximum(v @ w1.T, 0.0) @ w2.T

    att = jax.nn.sigmoid(fc(avg) + fc(mx))                         # (B, C)
    return x * att[:, None, :]


if __name__ == "__main__":
    key = jax.random.PRNGKey(0)
    kx, k1, k2 = jax.random.split(key, 3)

    B, h, C, rate = 2, 8, 32, 4          # ChannelAttention(channel=32, rate=4)
    L, Cmid = h * h, C // rate           # x: (B, L, C) with L = h*h

    x = jax.random.normal(kx, (B, L, C), jnp.float32)
    w1 = jax.random.normal(k1, (Cmid, C), jnp.float32) * 0.1    # Conv2d(C, C//rate, 1)
    w2 = jax.random.normal(k2, (C, Cmid), jnp.float32) * 0.1    # Conv2d(C//rate, C, 1)

    ref = channel_attention_ref(x, w1, w2)

    # Fused single-pass path.
    out = jax.block_until_ready(jax.jit(channel_attention)(x, w1, w2))
    assert out.shape == (B, L, C), out.shape
    assert bool(jnp.all(jnp.isfinite(out)))
    assert bool(jnp.allclose(out, ref, atol=1e-5, rtol=1e-5))

    # Two-pass fallback path (exercised explicitly at the same small shape).
    out2 = jax.block_until_ready(
        jax.jit(functools.partial(channel_attention, force_two_pass=True))(x, w1, w2))
    assert bool(jnp.allclose(out2, ref, atol=1e-5, rtol=1e-5))

    print("KERNEL_OK")
</pallas_src>

<mosaic_0001>
module attributes {stable_mosaic.version = 11 : i64} {
  func.func @_fused_kernel(%arg0: i32, %arg1: memref<1x64x32xf32, #tpu.memory_space<vmem>>, %arg2: memref<32x8xf32, #tpu.memory_space<vmem>>, %arg3: memref<8x32xf32, #tpu.memory_space<vmem>>, %arg4: memref<1x64x32xf32, #tpu.memory_space<vmem>>) attributes {dimension_semantics = [#tpu.dimension_semantics<parallel>], iteration_bounds = array<i64: 2>, scalar_prefetch = 0 : i64, scratch_operands = 0 : i64, tpu.core_type = #tpu.core_type<tc>, window_params = [{transform_indices = @transform_0, window_bounds = array<i64: 1, 64, 32>}, {pipeline_mode = #tpu.pipeline_mode<synchronous>, transform_indices = @transform_1, window_bounds = array<i64: 32, 8>}, {pipeline_mode = #tpu.pipeline_mode<synchronous>, transform_indices = @transform_2, window_bounds = array<i64: 8, 32>}, {transform_indices = @transform_3, window_bounds = array<i64: 1, 64, 32>}]} {
    %c0 = arith.constant 0 : index
    %c0_0 = arith.constant 0 : index
    %c0_1 = arith.constant 0 : index
    %0 = vector.load %arg1[%c0, %c0_0, %c0_1] : memref<1x64x32xf32, #tpu.memory_space<vmem>>, vector<1x64x32xf32>
    %1 = vector.shape_cast %0 : vector<1x64x32xf32> to vector<64x32xf32>
    %cst = arith.constant dense<0.000000e+00> : vector<32xf32>
    %2 = vector.multi_reduction <add>, %1, %cst [0] : vector<64x32xf32> to vector<32xf32>
    %3 = vector.shape_cast %2 : vector<32xf32> to vector<1x32xf32>
    %cst_2 = arith.constant 1.562500e-02 : f32
    %4 = vector.broadcast %cst_2 : f32 to vector<1x32xf32>
    %5 = arith.mulf %3, %4 : vector<1x32xf32>
    %cst_3 = arith.constant dense<0xFF800000> : vector<32xf32>
    %6 = vector.multi_reduction <maximumf>, %1, %cst_3 [0] : vector<64x32xf32> to vector<32xf32>
    %7 = vector.shape_cast %6 : vector<32xf32> to vector<1x32xf32>
    %c0_4 = arith.constant 0 : index
    %c0_5 = arith.constant 0 : index
    %8 = vector.load %arg2[%c0_4, %c0_5] : memref<32x8xf32, #tpu.memory_space<vmem>>, vector<32x8xf32>
    %cst_6 = arith.constant dense<0.000000e+00> : vector<1x8xf32>
    %9 = tpu.matmul %5, %8, %cst_6 {dimension_numbers = #tpu.dot_dimension_numbers<[1], [0], [0], [1], [0, 0, 1, 1], [], []>} : vector<1x32xf32>, vector<32x8xf32>, vector<1x8xf32> -> vector<1x8xf32>
    %cst_7 = arith.constant 0.000000e+00 : f32
    %10 = vector.broadcast %cst_7 : f32 to vector<1x8xf32>
    %11 = arith.maximumf %9, %10 : vector<1x8xf32>
    %c0_8 = arith.constant 0 : index
    %c0_9 = arith.constant 0 : index
    %12 = vector.load %arg3[%c0_8, %c0_9] : memref<8x32xf32, #tpu.memory_space<vmem>>, vector<8x32xf32>
    %cst_10 = arith.constant dense<0.000000e+00> : vector<1x32xf32>
    %13 = tpu.matmul %11, %12, %cst_10 {dimension_numbers = #tpu.dot_dimension_numbers<[1], [0], [0], [1], [0, 0, 1, 1], [], []>} : vector<1x8xf32>, vector<8x32xf32>, vector<1x32xf32> -> vector<1x32xf32>
    %c0_11 = arith.constant 0 : index
    %c0_12 = arith.constant 0 : index
    %14 = vector.load %arg2[%c0_11, %c0_12] : memref<32x8xf32, #tpu.memory_space<vmem>>, vector<32x8xf32>
    %cst_13 = arith.constant dense<0.000000e+00> : vector<1x8xf32>
    %15 = tpu.matmul %7, %14, %cst_13 {dimension_numbers = #tpu.dot_dimension_numbers<[1], [0], [0], [1], [0, 0, 1, 1], [], []>} : vector<1x32xf32>, vector<32x8xf32>, vector<1x8xf32> -> vector<1x8xf32>
    %cst_14 = arith.constant 0.000000e+00 : f32
    %16 = vector.broadcast %cst_14 : f32 to vector<1x8xf32>
    %17 = arith.maximumf %15, %16 : vector<1x8xf32>
    %c0_15 = arith.constant 0 : index
    %c0_16 = arith.constant 0 : index
    %18 = vector.load %arg3[%c0_15, %c0_16] : memref<8x32xf32, #tpu.memory_space<vmem>>, vector<8x32xf32>
    %cst_17 = arith.constant dense<0.000000e+00> : vector<1x32xf32>
    %19 = tpu.matmul %17, %18, %cst_17 {dimension_numbers = #tpu.dot_dimension_numbers<[1], [0], [0], [1], [0, 0, 1, 1], [], []>} : vector<1x8xf32>, vector<8x32xf32>, vector<1x32xf32> -> vector<1x32xf32>
    %20 = arith.addf %13, %19 : vector<1x32xf32>
    %cst_18 = arith.constant 0.000000e+00 : f32
    %21 = vector.broadcast %cst_18 : f32 to vector<1x32xf32>
    %22 = arith.subf %21, %20 : vector<1x32xf32>
    %23 = math.exp %22 : vector<1x32xf32>
    %cst_19 = arith.constant 1.000000e+00 : f32
    %24 = vector.broadcast %cst_19 : f32 to vector<1x32xf32>
    %25 = arith.addf %24, %23 : vector<1x32xf32>
    %cst_20 = arith.constant 1.000000e+00 : f32
    %26 = vector.broadcast %cst_20 : f32 to vector<1x32xf32>
    %27 = arith.divf %26, %25 : vector<1x32xf32>
    %28 = vector.broadcast %27 : vector<1x32xf32> to vector<64x32xf32>
    %29 = arith.mulf %1, %28 : vector<64x32xf32>
    %c0_21 = arith.constant 0 : index
    %c0_22 = arith.constant 0 : index
    %c0_23 = arith.constant 0 : index
    %30 = vector.load %arg4[%c0_21, %c0_22, %c0_23] : memref<1x64x32xf32, #tpu.memory_space<vmem>>, vector<1x64x32xf32>
    %31 = vector.shape_cast %30 : vector<1x64x32xf32> to vector<64x32xf32>
    %32 = vector.shape_cast %29 : vector<64x32xf32> to vector<1x64x32xf32>
    tpu.vector_store %arg4[%c0_21, %c0_22, %c0_23], %32 {strides = array<i32>} : memref<1x64x32xf32, #tpu.memory_space<vmem>>, vector<1x64x32xf32>,
    return
  }
  func.func @transform_0(%arg0: i32) -> (i32, i32, i32) {
    %c0_i32 = arith.constant 0 : i32
    %c0_i32_0 = arith.constant 0 : i32
    %c0_i32_1 = arith.constant 0 : i32
    return %arg0, %c0_i32, %c0_i32_0 : i32, i32, i32
  }
  func.func @transform_1(%arg0: i32) -> (i32, i32) {
    %c0_i32 = arith.constant 0 : i32
    %c0_i32_0 = arith.constant 0 : i32
    %c0_i32_1 = arith.constant 0 : i32
    return %c0_i32, %c0_i32_0 : i32, i32
  }
  func.func @transform_2(%arg0: i32) -> (i32, i32) {
    %c0_i32 = arith.constant 0 : i32
    %c0_i32_0 = arith.constant 0 : i32
    %c0_i32_1 = arith.constant 0 : i32
    return %c0_i32, %c0_i32_0 : i32, i32
  }
  func.func @transform_3(%arg0: i32) -> (i32, i32, i32) {
    %c0_i32 = arith.constant 0 : i32
    %c0_i32_0 = arith.constant 0 : i32
    %c0_i32_1 = arith.constant 0 : i32
    return %arg0, %c0_i32, %c0_i32_0 : i32, i32, i32
  }
}

</mosaic_0001>

<bundles_post_ra>
// kernel: channel_attention.1
= control target key start
LH: loop header
LB: loop body
LE: loop exit
PB: predicated region body
PF: predicated region fallthrough
CT: control target
= control target key end

     0   :  { %s471_s12 = smov 0   ;;  %s576_s0 = inlined_call_operand.vmem [shape: f32[2,64,32], index: 0, kind: input, shape index: {}]   ;;  %s577_s1 = inlined_call_operand.vmem [shape: f32[32,8], index: 1, kind: input, shape index: {}]   ;;  %s578_s2 = inlined_call_operand.vmem [shape: f32[8,32], index: 2, kind: input, shape index: {}]   ;;  %s579_s3 = inlined_call_operand.vmem [shape: f32[2,64,32], index: 3, kind: output, shape index: {}]  }
   0x1 LB: > { %s414_s13 = sadd.s32 4294967295, %s449_s12   ;;  %p418_p0 = scmp.ge.s32.totalorder %s449_s12, 1  ;;  %s449_s12 = sphi %s471_s12, %s13_s12  }
   0x2   : > { %p137_p1 = scmp.lt.s32.totalorder %s449_s12, 3 }
   0x4   : > { %p138_p2 = pnand %p418_p0, %p137_p1 }
   0x5   : > { %p161_p3 = scmp.lt.s32.totalorder (!%p138_p2), %s414_s13, 1 }
   0x6   : > { %141 = sbr.rel (%p138_p2) target bundleno = 348 (0x15c), region = 32 }
   0xb   : > { %v226_v0 = vld [vmem:[%s577_s1 + $0x18] sm:$0xff]  ;;  %v225_v1 = vld [vmem:[%s577_s1 + $0x10] sm:$0xff]  ;;  %v224_v2 = vld [vmem:[%s577_s1 + $0x8] sm:$0xff]  ;;  %s581_s13 = smov (!%p161_p3, %s414_s13), 1  ;;  %vm179_vm0 = vcmask 261120   ;;  %vm276_vm1 = vcmask 64512  }
   0xc   : > { %242 = vmatpush.msra.mxu0 %v226_v0  ;;  %267 = vmatpush.msra.mxu1 %v226_v0  ;;  %v223_v3 = vld [vmem:[%s577_s1] sm:$0xff]  ;;  %s429_s22 = sshll.u32 %s581_s13, 6 }
   0xd   : > { %s165_s25 = scalar_lea.vmem %s576_s0, %s429_s22  ;;  %v251_v55 = vld [vmem:[%s578_s2] sm:$0xff]  ;;  %s170_s30 = scalar_lea.vmem %s579_s3, %s429_s22 }
   0xe   : > { %243 = vmatpush.msra.mxu0 %v225_v1  ;;  %268 = vmatpush.msra.mxu1 %v225_v1  ;;  %v499_v4 = vld [vmem:[%s165_s25] sm:$0xff]  ;;  %v501_v5 = vld [vmem:[%s165_s25 + $0x8] sm:$0xff]  ;;  %v503_v6 = vld [vmem:[%s165_s25 + $0x10] sm:$0xff] }
   0xf   : > { %v505_v7 = vld [vmem:[%s165_s25 + $0x18] sm:$0xff]  ;;  %v507_v8 = vld [vmem:[%s165_s25 + $0x20] sm:$0xff]  ;;  %v180_v9 = vsel %vm179_vm0, %v499_v4, 0.0  ;;  %v181_v10 = vsel %vm179_vm0, %v501_v5, 0.0  ;;  %v183_v11 = vsel %vm179_vm0, %v503_v6, 0.0  ;;  %v515_v12 = vld [vmem:[%s165_s25 + $0x30] sm:$0xff]  ;;  %295 = vmatpush.msra.mxu2 %v251_v55  ;;  %318 = vmatpush.msra.mxu3 %v251_v55 }
  0x10   : > { %244 = vmatpush.msra.mxu0 %v224_v2  ;;  %269 = vmatpush.msra.mxu1 %v224_v2  ;;  %v517_v13 = vld [vmem:[%s165_s25 + $0x38] sm:$0xff]  ;;  %v182_v14 = vadd.f32 %v181_v10, %v180_v9  ;;  %v185_v15 = vsel %vm179_vm0, %v505_v7, 0.0  ;;  %v187_v16 = vsel %vm179_vm0, %v507_v8, 0.0  ;;  %v202_v17 = vsel %vm179_vm0, %v499_v4, -inf  ;;  %v527_v19 = vld [vmem:[%s165_s25 + $0x28] sm:$0xff] }
  0x11   : > { %v203_v18 = vsel %vm179_vm0, %v501_v5, -inf  ;;  %v204_v21 = vsel %vm179_vm0, %v503_v6, -inf  ;;  %v205_v22 = vsel %vm179_vm0, %v505_v7, -inf  ;;  %v206_v23 = vsel %vm179_vm0, %v507_v8, -inf }
  0x12   : > { %245 = vmatpush.msra.mxu0 %v223_v3  ;;  %270 = vmatpush.msra.mxu1 %v223_v3  ;;  %v184_v20 = vadd.f32 %v183_v11, %v182_v14  ;;  %v207_v24 = vmax.f32 %v202_v17, %v206_v23  ;;  %v208_v25 = vsel %vm179_vm0, %v527_v19, -inf  ;;  %v210_v26 = vsel %vm179_vm0, %v515_v12, -inf }
  0x13   : > { %v212_v27 = vsel %vm179_vm0, %v517_v13, -inf  ;;  %v209_v29 = vmax.f32 %v203_v18, %v208_v25  ;;  %v211_v30 = vmax.f32 %v204_v21, %v210_v26  ;;  %v189_v32 = vsel %vm179_vm0, %v527_v19, 0.0 }
  0x14   : > { %v186_v28 = vadd.f32 %v185_v15, %v184_v20  ;;  %v213_v31 = vmax.f32 %v205_v22, %v212_v27  ;;  %v191_v36 = vsel %vm179_vm0, %v515_v12, 0.0  ;;  %v193_v39 = vsel %vm179_vm0, %v517_v13, 0.0 }
  0x15   : > { %v214_v34 = vmax.f32 %v207_v24, %v209_v29 }
  0x16   : > { %v188_v33 = vadd.f32 %v187_v16, %v186_v28  ;;  %v215_v35 = vmax.f32 %v211_v30, %v213_v31 }
  0x18   : > { %v190_v37 = vadd.f32 %v189_v32, %v188_v33  ;;  %v216_v38 = vmax.f32 %v214_v34, %v215_v35 }
  0x1a   : > { %v192_v40 = vadd.f32 %v191_v36, %v190_v37  ;;  %v217_v41 = vrot.slane %v216_v38, 4 }
  0x1c   : > { %v194_v42 = vadd.f32 %v193_v39, %v192_v40  ;;  %v218_v43 = vmax.f32 %v216_v38, %v217_v41 }
  0x1e   : > { %v195_v44 = vrot.slane %v194_v42, 4  ;;  %v219_v45 = vrot.slane %v218_v43, 2 }
  0x20   : > { %v196_v46 = vadd.f32 %v195_v44, %v194_v42  ;;  %v220_v47 = vmax.f32 %v218_v43, %v219_v45 }
  0x22   : > { %v197_v48 = vrot.slane %v196_v46, 2  ;;  %v221_v49 = vrot.slane %v220_v47, 1 }
  0x24   : > { %v198_v50 = vadd.f32 %v197_v48, %v196_v46  ;;  %v222_v51 = vmax.f32 %v220_v47, %v221_v49 }
  0x26   : > { %v199_v52 = vrot.slane %v198_v50, 1  ;;  %424 = vmatmul.msk.f32.vlgmr.msra.gmra.mxu1 %vm179_vm0, %v222_v51 }
  0x28   : > { %v200_v53 = vadd.f32 %v199_v52, %v198_v50 }
  0x2a   : > { %v201_v54 = vmul.f32 0.015625, %v200_v53 }
  0x2c   : > { %423 = vmatmul.msk.f32.vlgmr.msra.gmra.mxu0 %vm179_vm0, %v201_v54 }
  0xa3   : > { %v272_v56 = vpop.f32.mrf.mxu1 }
  0xa4   : > { %v275_v57 = vmax.f32 %v272_v56, 0.0 }
  0xa6   : > { %425 = vmatmul.msk.f32.vlgmr.msra.gmra.mxu2 %vm276_vm1, %v275_v57 }
  0xa9   : > { %v247_v58 = vpop.f32.mrf.mxu0 }
  0xaa   : > { %v250_v59 = vmax.f32 %v247_v58, 0.0 }
  0xac   : > { %426 = vmatmul.msk.f32.vlgmr.msra.gmra.mxu3 %vm276_vm1, %v250_v59 }
 0x129   : > { %v297_v60 = vpop.f32.mrf.mxu2 }
 0x12f   : > { %v320_v61 = vpop.f32.mrf.mxu3 }
 0x130   : > { %v321_v62 = vadd.f32 %v320_v61, %v297_v60 }
 0x132   : > { %v323_v63 = vsub.f32 0.0, %v321_v62 }
 0x134   : > { %v324_v0 = vmul.f32 1.442695, %v323_v63 }
 0x136   : > { %439 = vpow2.f32 %v324_v0 }
 0x13c   : > { %v440_v1 = vpop.eup %439 }
 0x13d   : > { %v326_v2 = vadd.f32 1.0, %v440_v1 }
 0x13f   : > { %441 = vrcp.f32 %v326_v2  ;;  %v338_v11 = vand.u32 2147483648, %v326_v2  ;;  %v336_v15 = vand.u32 2147483647, %v326_v2  ;;  %vm332_vm3 = vweird.f32 %v326_v2 }
 0x141   : > { %v339_v17 = vor.u32 1.1754944e-38, %v338_v11  ;;  %vm337_vm5 = vcmp.eq.f32.partialorder %v336_v15, 8.507059e+37 }
 0x145   : > { %v442_v3 = vpop.eup %441 }
 0x146   : > { %v328_v9 = vmul.f32 %v442_v3, %v326_v2  ;;  %vm333_vm2 = vweird.f32 %v442_v3 }
 0x147   : > { %vm334_vm4 = vmor %vm332_vm3, %vm333_vm2 }
 0x148   : > { %v329_v10 = vsub.f32 1.0, %v328_v9 }
 0x14a   : > { %v330_v14 = vmul.f32 %v442_v3, %v329_v10 }
 0x14c   : > { %v331_v16 = vadd.f32 %v442_v3, %v330_v14 }
 0x14e   : > { %v335_v18 = vsel %vm334_vm4, %v442_v3, %v331_v16 }
 0x14f   : > { %v340_v20 = vsel %vm337_vm5, %v339_v17, %v335_v18 }
 0x150   : > { %v342_v21 = vperm.slane %v340_v20, 0 }
 0x152   : > { %v343_v22 = vmul.f32 %v342_v21, %v499_v4  ;;  %v344_v23 = vmul.f32 %v342_v21, %v501_v5  ;;  %v345_v24 = vmul.f32 %v342_v21, %v503_v6  ;;  %v346_v25 = vmul.f32 %v342_v21, %v505_v7 }
 0x153   : > { %v347_v26 = vmul.f32 %v342_v21, %v507_v8  ;;  %v348_v27 = vmul.f32 %v342_v21, %v527_v19  ;;  %v349_v28 = vmul.f32 %v342_v21, %v515_v12  ;;  %v350_v4 = vmul.f32 %v342_v21, %v517_v13 }
 0x154   : > { %351 = vst.msk [vmem:[%s170_s30] sm:$0xff] %vm179_vm0, %v343_v22 }
 0x155   : > { %352 = vst.msk [vmem:[%s170_s30 + $0x8] sm:$0xff] %vm179_vm0, %v344_v23 }
 0x156   : > { %353 = vst.msk [vmem:[%s170_s30 + $0x10] sm:$0xff] %vm179_vm0, %v345_v24 }
 0x157   : > { %354 = vst.msk [vmem:[%s170_s30 + $0x18] sm:$0xff] %vm179_vm0, %v346_v25 }
 0x158   : > { %355 = vst.msk [vmem:[%s170_s30 + $0x20] sm:$0xff] %vm179_vm0, %v347_v26 }
 0x159   : > { %356 = vst.msk [vmem:[%s170_s30 + $0x28] sm:$0xff] %vm179_vm0, %v348_v27 }
 0x15a   : > { %357 = vst.msk [vmem:[%s170_s30 + $0x30] sm:$0xff] %vm179_vm0, %v349_v28 }
 0x15b   : > { %358 = vst.msk [vmem:[%s170_s30 + $0x38] sm:$0xff] %vm179_vm0, %v350_v4 }
 0x15c PF: > { %s13_s12 = sadd.s32 1, %s449_s12  }
 0x15d   : > { %p10_p4 = scmp.ge.s32.totalorder %s13_s12, 4  }
 0x15f   :  { %12 = sbr.rel (!%p10_p4) target bundleno = 1 (0x1), region = 62 }

</bundles_post_ra>
